<compile_context>
chip_gen: v7x
topology: tpu7x:2x2x1
jax: 0.10.0
libtpu: 0.0.40
codegen_flags: <defaults>
</compile_context>

<pallas_src>
from functools import partial

import jax
import jax.numpy as jnp
from jax.experimental import pallas as pl
from jax.experimental.pallas import tpu as pltpu

# Fixed (non-trainable) parameters from GradLayer.__init__ / get_gray:
#   weight_v = [[0,-1,0],[0,0,0],[0,1,0]]   ->  x_v[i,j] = x[i+1,j] - x[i-1,j]
#   weight_h = [[0,0,0],[-1,0,1],[0,0,0]]   ->  x_h[i,j] = x[i,j+1] - x[i,j-1]
GRAY_COEFFS = (65.738 / 256.0, 129.057 / 256.0, 25.064 / 256.0)


def _to_gray(v):
    """v: (C, rows, W) -> (rows, W) float32 (ITU-R BT.601 coeffs / 256)."""
    v = v.astype(jnp.float32)
    if v.shape[0] == 3:
        return v[0] * GRAY_COEFFS[0] + v[1] * GRAY_COEFFS[1] + v[2] * GRAY_COEFFS[2]
    return v[0]


def _grad_mag_kernel(x_ref, up_ref, dn_ref, mag_ref, stat_ref, *, img_h):
    """Pass 1: |grad| for one (image, H-tile) block + packed per-block (min, -max)."""
    ti = pl.program_id(1)

    gray = _to_gray(x_ref[0])                      # (tile_h, W) f32
    th, w = gray.shape
    row0 = ti * th                                 # global row of local row 0
    strip_h = up_ref.shape[2]

    # Halo rows: convert only the single boundary row of each strip (not the full strip).
    prev_row = _to_gray(up_ref[0, :, strip_h - 1:strip_h, :])   # (1, W) row above the tile
    next_row = _to_gray(dn_ref[0, :, 0:1, :])                   # (1, W) row below the tile
    prev_row = prev_row * (ti > 0).astype(jnp.float32)          # zero at the image top

    # Tiny boundary masks: (tile_h, 1) and (1, W) — no full-size iota temporaries.
    row = jax.lax.broadcasted_iota(jnp.int32, (th, 1), 0)
    col = jax.lax.broadcasted_iota(jnp.int32, (1, w), 1)
    grow = row + row0                                            # global row index

    # x[r-1, c] / x[r+1, c] via XLU sublane rolls, boundary rows patched with halos.
    x_up = jnp.where(row == 0, prev_row, pltpu.roll(gray, shift=1, axis=0))
    x_dn = jnp.where(row == th - 1, next_row, pltpu.roll(gray, shift=th - 1, axis=0))
    # Zero below the image bottom (also neutralizes garbage rows of a partial last tile).
    x_dn = jnp.where(grow >= img_h - 1, 0.0, x_dn)
    # x[r, c+1] / x[r, c-1] via lane rolls, zero at the left/right image border.
    x_rt = jnp.where(col == w - 1, 0.0, pltpu.roll(gray, shift=w - 1, axis=1))
    x_lt = jnp.where(col == 0, 0.0, pltpu.roll(gray, shift=1, axis=1))

    g_v = x_dn - x_up
    g_h = x_rt - x_lt
    mag = jnp.sqrt(g_v * g_v + g_h * g_h + 1e-6)
    mag_ref[0] = mag            # rows past the image bottom are clipped on write-back

    # Per-block stats, excluding padded rows of a partial trailing tile; pack (min, -max)
    # into one (8, 256) output block so a single wrapper-side jnp.min recovers both.
    valid = grow < img_h
    mn = jnp.min(jnp.where(valid, mag, jnp.inf))
    mx = jnp.max(jnp.where(valid, mag, -jnp.inf))
    stat_ref[0, 0] = jnp.concatenate(
        [jnp.full((8, 128), mn, jnp.float32),
         jnp.full((8, 128), -mx, jnp.float32)], axis=1)


def _normalize_kernel(ab_ref, mag_ref, out_ref):
    """Pass 2: fused global min-max normalization, out = mag * a + b (in place)."""
    out_ref[...] = mag_ref[...] * ab_ref[0] + ab_ref[1]


def _vmem_capacity_bytes():
    """Physical VMEM per TensorCore; conservative 64 MiB (v7x) fallback."""
    try:
        info = pltpu.get_tpu_info()
        for name in ("vmem_capacity_bytes", "vmem_bytes", "vmem_size_bytes"):
            v = getattr(info, name, None)
            if v:
                return int(v)
    except Exception:
        pass
    return 64 * 1024 * 1024


def _pick_tile_h(h, w, c, in_itemsize, sub, budget_bytes):
    """Largest sublane-aligned tile height whose pass-1 working set fits the budget."""
    if h <= sub:
        return h
    # Live VMEM per tile row: double-buffered centre input + mag output, plus ~6
    # tile-sized f32 temporaries inside the body (gray, 4 shifted neighbours, mag).
    per_row = w * (2 * c * in_itemsize + 2 * 4 + 6 * 4)
    fixed = 2 * 2 * c * sub * w * in_itemsize + 2 * 8 * 256 * 4   # halo strips + stats
    tile_h = (budget_bytes - fixed) // max(per_row, 1)
    cap_h = -(-h // sub) * sub                  # H rounded up to the sublane multiple
    tile_h = int(min(tile_h, 2048, cap_h))
    tile_h -= tile_h % sub
    return max(tile_h, sub)


@partial(jax.jit, static_argnames=("tile_h",))
def grad_layer(x, tile_h=None):
    """Pallas implementation of GradLayer.forward. x: (N, C, H, W), C in {1, 3}."""
    n, c, h, w = x.shape
    assert c in (1, 3), "GradLayer expects 1 or 3 input channels"
    if x.dtype not in (jnp.float32, jnp.bfloat16, jnp.float16):
        x = x.astype(jnp.float32)
    in_itemsize = jnp.dtype(x.dtype).itemsize
    sub = 8 * max(1, 4 // in_itemsize)          # sublane multiple for this input dtype

    # Generation-aware VMEM policy (128 MiB on v5e/v6e, 64 MiB on v7x).
    phys_vmem = _vmem_capacity_bytes()
    vmem_limit = int(min(phys_vmem * 3 // 4, 100 * 1024 * 1024))
    if tile_h is None:
        tile_h = _pick_tile_h(h, w, c, in_itemsize, sub, int(vmem_limit * 0.8))
    elif h <= sub:
        tile_h = h
    else:
        tile_h = int(tile_h)
        assert tile_h >= sub and tile_h % sub == 0, "tile_h must be a sublane multiple"

    strip_h = min(sub, h)                        # halo strip height
    n_h = pl.cdiv(h, tile_h)                     # cdiv grid: last H tile may be partial
    bh = max(tile_h // strip_h, 1)               # strip blocks per H tile
    hi_clamp = max(pl.cdiv(h, strip_h) - 1, 0)   # last strip-block index (kept in bounds)

    # TODO(synk): on v7x consider pltpu.CORE_PARALLEL on the larger grid axis to pin work
    # across its two TensorCores; plain "parallel" is kept here for portability.
    cparams1 = pltpu.CompilerParams(
        dimension_semantics=("parallel", "parallel"),
        vmem_limit_bytes=vmem_limit,
    )

    # ---- pass 1: |grad| + packed per-block stats (streamed, auto double-buffered) ----
    mag, stats = pl.pallas_call(
        partial(_grad_mag_kernel, img_h=h),
        grid=(n, n_h),
        in_specs=(
            # centre tile (native input dtype; cast happens inside the kernel)
            pl.BlockSpec((1, c, tile_h, w), lambda ni, ti: (ni, 0, ti, 0)),
            # strip ending just above this tile (clamped at the top)
            pl.BlockSpec((1, c, strip_h, w),
                         lambda ni, ti: (ni, 0, jnp.maximum(ti * bh - 1, 0), 0)),
            # strip starting just below this tile (clamped at the bottom)
            pl.BlockSpec((1, c, strip_h, w),
                         lambda ni, ti: (ni, 0, jnp.minimum((ti + 1) * bh, hi_clamp), 0)),
        ),
        out_specs=(
            pl.BlockSpec((1, tile_h, w), lambda ni, ti: (ni, ti, 0)),
            pl.BlockSpec((1, 1, 8, 256), lambda ni, ti: (ni, ti, 0, 0)),
        ),
        out_shape=(
            jax.ShapeDtypeStruct((n, h, w), jnp.float32),
            jax.ShapeDtypeStruct((n, n_h, 8, 256), jnp.float32),
        ),
        compiler_params=cparams1,
    )(x, x, x)

    # ---- global min/max -> single fused scale/offset (exact scalar math) ----
    mn = jnp.min(stats[..., :128])
    mx = -jnp.min(stats[..., 128:])
    a = 2.0 / (mx - mn + 1e-6)
    b = -a * mn - 1.0
    ab = jnp.stack([a, b]).astype(jnp.float32)

    # ---- pass 2: normalize in place over a lane-dense flat view of the mag buffer ----
    total = n * h * w
    if total % 128 == 0:
        ld = 128
        while ld * 2 <= 32768 and total % (ld * 2) == 0:
            ld *= 2                              # large multiple of 128 -> unmasked stores
        rows = total // ld
        if rows * ld * 4 <= (4 << 20):
            tile_r = rows                        # single block (full-dim exemption)
        else:
            tile_r = max(8, ((2 << 20) // (ld * 4)) // 8 * 8)
        flat = mag.reshape(rows, ld)             # contiguous reshape: free bitcast
        out = pl.pallas_call(
            _normalize_kernel,
            grid=(pl.cdiv(rows, tile_r),),
            in_specs=(
                pl.BlockSpec(memory_space=pltpu.MemorySpace.SMEM),   # (a, b) scalars
                pl.BlockSpec((tile_r, ld), lambda i: (i, 0)),
            ),
            out_specs=pl.BlockSpec((tile_r, ld), lambda i: (i, 0)),
            out_shape=jax.ShapeDtypeStruct((rows, ld), jnp.float32),
            input_output_aliases={1: 0},
            compiler_params=pltpu.CompilerParams(
                dimension_semantics=("parallel",),
                vmem_limit_bytes=vmem_limit,
            ),
        )(ab, flat)
        out = out.reshape(n, h, w)
    else:
        # Odd element count: leave the trivial affine to XLA (fuses with the copy).
        out = mag * a + b

    return out[:, None, :, :]                                   # (N, 1, H, W)


def _grad_layer_ref(x):
    """Pure-JAX reference mirroring the PyTorch module (for correctness check)."""
    x = jnp.asarray(x, jnp.float32)
    if x.shape[1] == 3:
        coeffs = jnp.array(GRAY_COEFFS, jnp.float32).reshape(1, 3, 1, 1)
        x = jnp.sum(x * coeffs, axis=1, keepdims=True)
    xp = jnp.pad(x, ((0, 0), (0, 0), (1, 1), (1, 1)))
    x_v = xp[:, :, 2:, 1:-1] - xp[:, :, :-2, 1:-1]
    x_h = xp[:, :, 1:-1, 2:] - xp[:, :, 1:-1, :-2]
    m = jnp.sqrt(x_v * x_v + x_h * x_h + 1e-6)
    m = (m - m.min()) / (m.max() - m.min() + 1e-6)
    return (m - 0.5) * 2.0


if __name__ == "__main__":
    key = jax.random.PRNGKey(0)
    k1, k2, k3, k4 = jax.random.split(key, 4)

    # (1) RGB input, default (VMEM-budget-driven) tiling -> single H tile.
    x1 = jax.random.normal(k1, (2, 3, 16, 16), dtype=jnp.float32)
    o1 = jax.block_until_ready(grad_layer(x1))
    assert o1.shape == (2, 1, 16, 16)
    assert jnp.max(jnp.abs(o1 - _grad_layer_ref(x1))) < 1e-4

    # (2) single-channel input (no gray conversion path).
    x2 = jax.random.normal(k2, (2, 1, 16, 16), dtype=jnp.float32)
    o2 = jax.block_until_ready(grad_layer(x2))
    assert o2.shape == (2, 1, 16, 16)
    assert jnp.max(jnp.abs(o2 - _grad_layer_ref(x2))) < 1e-4

    # (3) H=40 with tile_h=16: halo strips + a PARTIAL trailing tile (cdiv grid), W=128.
    x3 = jax.random.normal(k3, (1, 3, 40, 128), dtype=jnp.float32)
    o3 = jax.block_until_ready(grad_layer(x3, tile_h=16))
    assert o3.shape == (1, 1, 40, 128)
    assert jnp.max(jnp.abs(o3 - _grad_layer_ref(x3))) < 1e-4

    # (4) narrow W (not a multiple of 128) + multiple 8-row tiles.
    x4 = jax.random.normal(k4, (1, 3, 24, 48), dtype=jnp.float32)
    o4 = jax.block_until_ready(grad_layer(x4, tile_h=8))
    assert o4.shape == (1, 1, 24, 48)
    assert jnp.max(jnp.abs(o4 - _grad_layer_ref(x4))) < 1e-4

    print("KERNEL_OK")
</pallas_src>

<mosaic_0001>
module attributes {stable_mosaic.version = 11 : i64} {
  func.func @_grad_mag_kernel(%arg0: i32, %arg1: i32, %arg2: memref<1x3x16x16xf32, #tpu.memory_space<vmem>>, %arg3: memref<1x3x8x16xf32, #tpu.memory_space<vmem>>, %arg4: memref<1x3x8x16xf32, #tpu.memory_space<vmem>>, %arg5: memref<1x16x16xf32, #tpu.memory_space<vmem>>, %arg6: memref<1x1x8x256xf32, #tpu.memory_space<vmem>>) attributes {dimension_semantics = [#tpu.dimension_semantics<parallel>, #tpu.dimension_semantics<parallel>], iteration_bounds = array<i64: 2, 1>, scalar_prefetch = 0 : i64, scratch_operands = 0 : i64, tpu.core_type = #tpu.core_type<tc>, window_params = [{transform_indices = @transform_0, window_bounds = array<i64: 1, 3, 16, 16>}, {transform_indices = @transform_1, window_bounds = array<i64: 1, 3, 8, 16>}, {transform_indices = @transform_2, window_bounds = array<i64: 1, 3, 8, 16>}, {transform_indices = @transform_3, window_bounds = array<i64: 1, 16, 16>}, {transform_indices = @transform_4, window_bounds = array<i64: 1, 1, 8, 256>}]} {
    %c0 = arith.constant 0 : index
    %c0_0 = arith.constant 0 : index
    %c0_1 = arith.constant 0 : index
    %c0_2 = arith.constant 0 : index
    %0 = vector.load %arg2[%c0, %c0_0, %c0_1, %c0_2] : memref<1x3x16x16xf32, #tpu.memory_space<vmem>>, vector<1x3x16x16xf32>
    %1 = vector.shape_cast %0 : vector<1x3x16x16xf32> to vector<3x16x16xf32>
    %2 = vector.extract_strided_slice %1 {offsets = [0, 0, 0], sizes = [1, 16, 16], strides = [1, 1, 1]} : vector<3x16x16xf32> to vector<1x16x16xf32>
    %3 = vector.shape_cast %2 : vector<1x16x16xf32> to vector<16x16xf32>
    %cst = arith.constant 0.256789058 : f32
    %4 = vector.broadcast %cst : f32 to vector<16x16xf32>
    %5 = arith.mulf %3, %4 : vector<16x16xf32>
    %6 = vector.extract_strided_slice %1 {offsets = [1, 0, 0], sizes = [1, 16, 16], strides = [1, 1, 1]} : vector<3x16x16xf32> to vector<1x16x16xf32>
    %7 = vector.shape_cast %6 : vector<1x16x16xf32> to vector<16x16xf32>
    %cst_3 = arith.constant 0.504128933 : f32
    %8 = vector.broadcast %cst_3 : f32 to vector<16x16xf32>
    %9 = arith.mulf %7, %8 : vector<16x16xf32>
    %10 = arith.addf %5, %9 : vector<16x16xf32>
    %11 = vector.extract_strided_slice %1 {offsets = [2, 0, 0], sizes = [1, 16, 16], strides = [1, 1, 1]} : vector<3x16x16xf32> to vector<1x16x16xf32>
    %12 = vector.shape_cast %11 : vector<1x16x16xf32> to vector<16x16xf32>
    %cst_4 = arith.constant 0.0979062467 : f32
    %13 = vector.broadcast %cst_4 : f32 to vector<16x16xf32>
    %14 = arith.mulf %12, %13 : vector<16x16xf32>
    %15 = arith.addf %10, %14 : vector<16x16xf32>
    %c16_i32 = arith.constant 16 : i32
    %16 = arith.muli %arg1, %c16_i32 : i32
    %c0_5 = arith.constant 0 : index
    %c0_6 = arith.constant 0 : index
    %c7 = arith.constant 7 : index
    %c0_7 = arith.constant 0 : index
    %17 = vector.load %arg3[%c0_5, %c0_6, %c7, %c0_7] : memref<1x3x8x16xf32, #tpu.memory_space<vmem>>, vector<1x3x1x16xf32>
    %18 = vector.shape_cast %17 : vector<1x3x1x16xf32> to vector<3x1x16xf32>
    %19 = vector.extract_strided_slice %18 {offsets = [0, 0, 0], sizes = [1, 1, 16], strides = [1, 1, 1]} : vector<3x1x16xf32> to vector<1x1x16xf32>
    %20 = vector.shape_cast %19 : vector<1x1x16xf32> to vector<1x16xf32>
    %cst_8 = arith.constant 0.256789058 : f32
    %21 = vector.broadcast %cst_8 : f32 to vector<1x16xf32>
    %22 = arith.mulf %20, %21 : vector<1x16xf32>
    %23 = vector.extract_strided_slice %18 {offsets = [1, 0, 0], sizes = [1, 1, 16], strides = [1, 1, 1]} : vector<3x1x16xf32> to vector<1x1x16xf32>
    %24 = vector.shape_cast %23 : vector<1x1x16xf32> to vector<1x16xf32>
    %cst_9 = arith.constant 0.504128933 : f32
    %25 = vector.broadcast %cst_9 : f32 to vector<1x16xf32>
    %26 = arith.mulf %24, %25 : vector<1x16xf32>
    %27 = arith.addf %22, %26 : vector<1x16xf32>
    %28 = vector.extract_strided_slice %18 {offsets = [2, 0, 0], sizes = [1, 1, 16], strides = [1, 1, 1]} : vector<3x1x16xf32> to vector<1x1x16xf32>
    %29 = vector.shape_cast %28 : vector<1x1x16xf32> to vector<1x16xf32>
    %cst_10 = arith.constant 0.0979062467 : f32
    %30 = vector.broadcast %cst_10 : f32 to vector<1x16xf32>
    %31 = arith.mulf %29, %30 : vector<1x16xf32>
    %32 = arith.addf %27, %31 : vector<1x16xf32>
    %c0_11 = arith.constant 0 : index
    %c0_12 = arith.constant 0 : index
    %c0_13 = arith.constant 0 : index
    %c0_14 = arith.constant 0 : index
    %33 = vector.load %arg4[%c0_11, %c0_12, %c0_13, %c0_14] : memref<1x3x8x16xf32, #tpu.memory_space<vmem>>, vector<1x3x1x16xf32>
    %34 = vector.shape_cast %33 : vector<1x3x1x16xf32> to vector<3x1x16xf32>
    %35 = vector.extract_strided_slice %34 {offsets = [0, 0, 0], sizes = [1, 1, 16], strides = [1, 1, 1]} : vector<3x1x16xf32> to vector<1x1x16xf32>
    %36 = vector.shape_cast %35 : vector<1x1x16xf32> to vector<1x16xf32>
    %cst_15 = arith.constant 0.256789058 : f32
    %37 = vector.broadcast %cst_15 : f32 to vector<1x16xf32>
    %38 = arith.mulf %36, %37 : vector<1x16xf32>
    %39 = vector.extract_strided_slice %34 {offsets = [1, 0, 0], sizes = [1, 1, 16], strides = [1, 1, 1]} : vector<3x1x16xf32> to vector<1x1x16xf32>
    %40 = vector.shape_cast %39 : vector<1x1x16xf32> to vector<1x16xf32>
    %cst_16 = arith.constant 0.504128933 : f32
    %41 = vector.broadcast %cst_16 : f32 to vector<1x16xf32>
    %42 = arith.mulf %40, %41 : vector<1x16xf32>
    %43 = arith.addf %38, %42 : vector<1x16xf32>
    %44 = vector.extract_strided_slice %34 {offsets = [2, 0, 0], sizes = [1, 1, 16], strides = [1, 1, 1]} : vector<3x1x16xf32> to vector<1x1x16xf32>
    %45 = vector.shape_cast %44 : vector<1x1x16xf32> to vector<1x16xf32>
    %cst_17 = arith.constant 0.0979062467 : f32
    %46 = vector.broadcast %cst_17 : f32 to vector<1x16xf32>
    %47 = arith.mulf %45, %46 : vector<1x16xf32>
    %48 = arith.addf %43, %47 : vector<1x16xf32>
    %c0_i32 = arith.constant 0 : i32
    %49 = arith.cmpi sgt, %arg1, %c0_i32 : i32
    %50 = arith.extui %49 : i1 to i32
    %51 = arith.sitofp %50 : i32 to f32
    %52 = vector.broadcast %51 : f32 to vector<1x16xf32>
    %53 = arith.mulf %32, %52 : vector<1x16xf32>
    %54 = tpu.iota {dimensions = array<i32: 0>} : vector<16x1xi32>
    %55 = tpu.iota {dimensions = array<i32: 1>} : vector<1x16xi32>
    %56 = vector.broadcast %16 : i32 to vector<16x1xi32>
    %57 = arith.addi %54, %56 : vector<16x1xi32>
    %c0_i32_18 = arith.constant 0 : i32
    %58 = vector.broadcast %c0_i32_18 : i32 to vector<16x1xi32>
    %59 = arith.cmpi eq, %54, %58 : vector<16x1xi32>
    %c1_i32 = arith.constant 1 : i32
    %60 = tpu.dynamic_rotate %15 by %c1_i32 dim 0 : vector<16x16xf32>, i32 -> vector<16x16xf32>
    %61 = vector.shape_cast %59 : vector<16x1xi1> to vector<16x1xi1>
    %62 = vector.broadcast %61 : vector<16x1xi1> to vector<16x16xi1>
    %63 = vector.shape_cast %53 : vector<1x16xf32> to vector<1x16xf32>
    %64 = vector.broadcast %63 : vector<1x16xf32> to vector<16x16xf32>
    %65 = arith.select %62, %64, %60 : vector<16x16xi1>, vector<16x16xf32>
    %c15_i32 = arith.constant 15 : i32
    %66 = vector.broadcast %c15_i32 : i32 to vector<16x1xi32>
    %67 = arith.cmpi eq, %54, %66 : vector<16x1xi32>
    %c15_i32_19 = arith.constant 15 : i32
    %68 = tpu.dynamic_rotate %15 by %c15_i32_19 dim 0 : vector<16x16xf32>, i32 -> vector<16x16xf32>
    %69 = vector.shape_cast %67 : vector<16x1xi1> to vector<16x1xi1>
    %70 = vector.broadcast %69 : vector<16x1xi1> to vector<16x16xi1>
    %71 = vector.shape_cast %48 : vector<1x16xf32> to vector<1x16xf32>
    %72 = vector.broadcast %71 : vector<1x16xf32> to vector<16x16xf32>
    %73 = arith.select %70, %72, %68 : vector<16x16xi1>, vector<16x16xf32>
    %c15_i32_20 = arith.constant 15 : i32
    %74 = vector.broadcast %c15_i32_20 : i32 to vector<16x1xi32>
    %75 = arith.cmpi sge, %57, %74 : vector<16x1xi32>
    %cst_21 = arith.constant 0.000000e+00 : f32
    %76 = vector.shape_cast %75 : vector<16x1xi1> to vector<16x1xi1>
    %77 = vector.broadcast %76 : vector<16x1xi1> to vector<16x16xi1>
    %78 = vector.broadcast %cst_21 : f32 to vector<16x16xf32>
    %79 = arith.select %77, %78, %73 : vector<16x16xi1>, vector<16x16xf32>
    %c15_i32_22 = arith.constant 15 : i32
    %80 = vector.broadcast %c15_i32_22 : i32 to vector<1x16xi32>
    %81 = arith.cmpi eq, %55, %80 : vector<1x16xi32>
    %c15_i32_23 = arith.constant 15 : i32
    %82 = tpu.dynamic_rotate %15 by %c15_i32_23 dim 1 : vector<16x16xf32>, i32 -> vector<16x16xf32>
    %cst_24 = arith.constant 0.000000e+00 : f32
    %83 = vector.shape_cast %81 : vector<1x16xi1> to vector<1x16xi1>
    %84 = vector.broadcast %83 : vector<1x16xi1> to vector<16x16xi1>
    %85 = vector.broadcast %cst_24 : f32 to vector<16x16xf32>
    %86 = arith.select %84, %85, %82 : vector<16x16xi1>, vector<16x16xf32>
    %c0_i32_25 = arith.constant 0 : i32
    %87 = vector.broadcast %c0_i32_25 : i32 to vector<1x16xi32>
    %88 = arith.cmpi eq, %55, %87 : vector<1x16xi32>
    %c1_i32_26 = arith.constant 1 : i32
    %89 = tpu.dynamic_rotate %15 by %c1_i32_26 dim 1 : vector<16x16xf32>, i32 -> vector<16x16xf32>
    %cst_27 = arith.constant 0.000000e+00 : f32
    %90 = vector.shape_cast %88 : vector<1x16xi1> to vector<1x16xi1>
    %91 = vector.broadcast %90 : vector<1x16xi1> to vector<16x16xi1>
    %92 = vector.broadcast %cst_27 : f32 to vector<16x16xf32>
    %93 = arith.select %91, %92, %89 : vector<16x16xi1>, vector<16x16xf32>
    %94 = arith.subf %79, %65 : vector<16x16xf32>
    %95 = arith.subf %86, %93 : vector<16x16xf32>
    %96 = arith.mulf %94, %94 : vector<16x16xf32>
    %97 = arith.mulf %95, %95 : vector<16x16xf32>
    %98 = arith.addf %96, %97 : vector<16x16xf32>
    %cst_28 = arith.constant 9.99999997E-7 : f32
    %99 = vector.broadcast %cst_28 : f32 to vector<16x16xf32>
    %100 = arith.addf %98, %99 : vector<16x16xf32>
    %101 = math.sqrt %100 : vector<16x16xf32>
    %c0_29 = arith.constant 0 : index
    %c0_30 = arith.constant 0 : index
    %c0_31 = arith.constant 0 : index
    %102 = vector.load %arg5[%c0_29, %c0_30, %c0_31] : memref<1x16x16xf32, #tpu.memory_space<vmem>>, vector<1x16x16xf32>
    %103 = vector.shape_cast %102 : vector<1x16x16xf32> to vector<16x16xf32>
    %104 = vector.shape_cast %101 : vector<16x16xf32> to vector<1x16x16xf32>
    tpu.vector_store %arg5[%c0_29, %c0_30, %c0_31], %104 {strides = array<i32>} : memref<1x16x16xf32, #tpu.memory_space<vmem>>, vector<1x16x16xf32>,
    %c16_i32_32 = arith.constant 16 : i32
    %105 = vector.broadcast %c16_i32_32 : i32 to vector<16x1xi32>
    %106 = arith.cmpi slt, %57, %105 : vector<16x1xi32>
    %cst_33 = arith.constant 0x7F800000 : f32
    %107 = vector.shape_cast %106 : vector<16x1xi1> to vector<16x1xi1>
    %108 = vector.broadcast %107 : vector<16x1xi1> to vector<16x16xi1>
    %109 = vector.broadcast %cst_33 : f32 to vector<16x16xf32>
    %110 = arith.select %108, %101, %109 : vector<16x16xi1>, vector<16x16xf32>
    %111 = vector.shape_cast %110 : vector<16x16xf32> to vector<1x16x16xf32>
    %cst_34 = arith.constant dense<0x7F800000> : vector<1xf32>
    %112 = vector.multi_reduction <minimumf>, %111, %cst_34 [1, 2] : vector<1x16x16xf32> to vector<1xf32>
    %113 = vector.shape_cast %112 : vector<1xf32> to vector<1x1x1xf32>
    %114 = vector.extract %113[0, 0, 0] : f32 from vector<1x1x1xf32>
    %cst_35 = arith.constant 0xFF800000 : f32
    %115 = vector.shape_cast %106 : vector<16x1xi1> to vector<16x1xi1>
    %116 = vector.broadcast %115 : vector<16x1xi1> to vector<16x16xi1>
    %117 = vector.broadcast %cst_35 : f32 to vector<16x16xf32>
    %118 = arith.select %116, %101, %117 : vector<16x16xi1>, vector<16x16xf32>
    %119 = vector.shape_cast %118 : vector<16x16xf32> to vector<1x16x16xf32>
    %cst_36 = arith.constant dense<0xFF800000> : vector<1xf32>
    %120 = vector.multi_reduction <maximumf>, %119, %cst_36 [1, 2] : vector<1x16x16xf32> to vector<1xf32>
    %121 = vector.shape_cast %120 : vector<1xf32> to vector<1x1x1xf32>
    %122 = vector.extract %121[0, 0, 0] : f32 from vector<1x1x1xf32>
    %123 = vector.broadcast %114 : f32 to vector<8x128xf32>
    %cst_37 = arith.constant 0.000000e+00 : f32
    %124 = arith.subf %cst_37, %122 : f32
    %125 = vector.broadcast %124 : f32 to vector<8x128xf32>
    %126 = tpu.concatenate %123, %125 in 1 : vector<8x128xf32>, vector<8x128xf32> -> vector<8x256xf32>
    %c0_38 = arith.constant 0 : index
    %c0_39 = arith.constant 0 : index
    %c0_40 = arith.constant 0 : index
    %c0_41 = arith.constant 0 : index
    %127 = vector.load %arg6[%c0_38, %c0_39, %c0_40, %c0_41] : memref<1x1x8x256xf32, #tpu.memory_space<vmem>>, vector<1x1x8x256xf32>
    %128 = vector.shape_cast %127 : vector<1x1x8x256xf32> to vector<8x256xf32>
    %129 = vector.shape_cast %126 : vector<8x256xf32> to vector<1x1x8x256xf32>
    tpu.vector_store %arg6[%c0_38, %c0_39, %c0_40, %c0_41], %129 {strides = array<i32>} : memref<1x1x8x256xf32, #tpu.memory_space<vmem>>, vector<1x1x8x256xf32>,
    return
  }
  func.func @transform_0(%arg0: i32, %arg1: i32) -> (i32, i32, i32, i32) {
    %c0_i32 = arith.constant 0 : i32
    %c0_i32_0 = arith.constant 0 : i32
    %c0_i32_1 = arith.constant 0 : i32
    return %arg0, %c0_i32, %arg1, %c0_i32_0 : i32, i32, i32, i32
  }
  func.func @transform_1(%arg0: i32, %arg1: i32) -> (i32, i32, i32, i32) {
    %c2_i32 = arith.constant 2 : i32
    %0 = arith.muli %arg1, %c2_i32 : i32
    %c1_i32 = arith.constant 1 : i32
    %1 = arith.subi %0, %c1_i32 : i32
    %c0_i32 = arith.constant 0 : i32
    %2 = arith.maxsi %1, %c0_i32 : i32
    %c0_i32_0 = arith.constant 0 : i32
    %c0_i32_1 = arith.constant 0 : i32
    %c0_i32_2 = arith.constant 0 : i32
    return %arg0, %c0_i32_0, %2, %c0_i32_1 : i32, i32, i32, i32
  }
  func.func @transform_2(%arg0: i32, %arg1: i32) -> (i32, i32, i32, i32) {
    %c1_i32 = arith.constant 1 : i32
    %0 = arith.addi %arg1, %c1_i32 : i32
    %c2_i32 = arith.constant 2 : i32
    %1 = arith.muli %0, %c2_i32 : i32
    %c1_i32_0 = arith.constant 1 : i32
    %2 = arith.minsi %1, %c1_i32_0 : i32
    %c0_i32 = arith.constant 0 : i32
    %c0_i32_1 = arith.constant 0 : i32
    %c0_i32_2 = arith.constant 0 : i32
    return %arg0, %c0_i32, %2, %c0_i32_1 : i32, i32, i32, i32
  }
  func.func @transform_3(%arg0: i32, %arg1: i32) -> (i32, i32, i32) {
    %c0_i32 = arith.constant 0 : i32
    %c0_i32_0 = arith.constant 0 : i32
    return %arg0, %arg1, %c0_i32 : i32, i32, i32
  }
  func.func @transform_4(%arg0: i32, %arg1: i32) -> (i32, i32, i32, i32) {
    %c0_i32 = arith.constant 0 : i32
    %c0_i32_0 = arith.constant 0 : i32
    %c0_i32_1 = arith.constant 0 : i32
    return %arg0, %arg1, %c0_i32, %c0_i32_0 : i32, i32, i32, i32
  }
}

module attributes {stable_mosaic.version = 11 : i64} {
  func.func @_normalize_kernel(%arg0: i32, %arg1: memref<2xf32, #tpu.memory_space<smem>>, %arg2: memref<1x512xf32, #tpu.memory_space<vmem>>, %arg3: memref<1x512xf32, #tpu.memory_space<vmem>>) attributes {dimension_semantics = [#tpu.dimension_semantics<parallel>], iteration_bounds = array<i64: 1>, scalar_prefetch = 0 : i64, scratch_operands = 0 : i64, tpu.core_type = #tpu.core_type<tc>, window_params = [{transform_indices = @transform_0, window_bounds = array<i64: 2>}, {transform_indices = @transform_1, window_bounds = array<i64: 1, 512>}, {transform_indices = @transform_2, window_bounds = array<i64: 1, 512>}]} {
    %c0 = arith.constant 0 : index
    %c0_0 = arith.constant 0 : index
    %0 = vector.load %arg2[%c0, %c0_0] : memref<1x512xf32, #tpu.memory_space<vmem>>, vector<1x512xf32>
    %c0_1 = arith.constant 0 : index
    %1 = memref.load %arg1[%c0_1] : memref<2xf32, #tpu.memory_space<smem>>
    %2 = vector.broadcast %1 : f32 to vector<1x512xf32>
    %3 = arith.mulf %0, %2 : vector<1x512xf32>
    %c1 = arith.constant 1 : index
    %4 = memref.load %arg1[%c1] : memref<2xf32, #tpu.memory_space<smem>>
    %5 = vector.broadcast %4 : f32 to vector<1x512xf32>
    %6 = arith.addf %3, %5 : vector<1x512xf32>
    %c0_2 = arith.constant 0 : index
    %c0_3 = arith.constant 0 : index
    %7 = vector.load %arg3[%c0_2, %c0_3] : memref<1x512xf32, #tpu.memory_space<vmem>>, vector<1x512xf32>
    tpu.vector_store %arg3[%c0_2, %c0_3], %6 {strides = array<i32>} : memref<1x512xf32, #tpu.memory_space<vmem>>, vector<1x512xf32>,
    return
  }
  func.func @transform_0(%arg0: i32) -> i32 {
    %c0_i32 = arith.constant 0 : i32
    %c0_i32_0 = arith.constant 0 : i32
    return %c0_i32 : i32
  }
  func.func @transform_1(%arg0: i32) -> (i32, i32) {
    %c0_i32 = arith.constant 0 : i32
    %c0_i32_0 = arith.constant 0 : i32
    return %arg0, %c0_i32 : i32, i32
  }
  func.func @transform_2(%arg0: i32) -> (i32, i32) {
    %c0_i32 = arith.constant 0 : i32
    %c0_i32_0 = arith.constant 0 : i32
    return %arg0, %c0_i32 : i32, i32
  }
}

</mosaic_0001>

<bundles_post_ra>
// kernel: grad_layer.3
= control target key start
LH: loop header
LB: loop body
LE: loop exit
PB: predicated region body
PF: predicated region fallthrough
CT: control target
= control target key end

     0   :  { %7 = vsyncpa [#allocation3], 0  ;;  %s82_s0 = inlined_call_operand.vmem [shape: f32[2], index: 0, kind: input, shape index: {}]   ;;  %s83_s1 = inlined_call_operand.vmem [shape: f32[1,512], index: 1, kind: input, shape index: {}, may-alias: {1,2}]   ;;  %s84_s2 = inlined_call_operand.vmem [shape: f32[1,512], index: 2, kind: output, shape index: {}, may-alias: {1,2}]  }
   0x1   :  { %s14_s11 = sshll.u32 %s82_s0, 4  ;;  %s15_s11 = int_to_ptr.vmem [resolvable:$true] %s14_s11 }
   0x2   :  { %s43_s12 = scalar_lea.vmem %s15_s11, 16  ;;  %p48_p1 = scmp.lt.s32.totalorder %s15_s11, %s15_s11 }
   0x3   :  { %p44_p0 = scmp.ne.s32.totalorder %s15_s11, %s43_s12  ;;  %p49_p2 = scmp.lt.s32.totalorder %s43_s12, %s43_s12 }
   0x5   :  { %p50_p3 = por %p49_p2, %p48_p1 }
   0x7   :  { %p51_p4 = pnand %p50_p3, %p44_p0 }
   0x9   :  { %54 = shalt.err (!%p51_p4)
}
   0xa   :  { %s57_s13 = smov [#allocation2]  }
   0xb   :  { %17 = dma.vmem_to_smem %s15_s11, 16, %s57_s13, [#allocation3]  }
   0xc   :  { %55 = dma.done.wait [#allocation3], 16  }
   0xd   :  { %56 = vsyncadd [#allocation3], 4294967280 }
   0xe   :  { %23 = sfence }
   0xf   :  { %s25_s14 = sld [smem:[#allocation2]]  ;;  %s41_s15 = sld [smem:[#allocation2 + $0x1]]  ;;  %v24_v0 = vld [vmem:[%s83_s1] sm:$0xf]  ;;  %v31_v1 = vlaneseq }
  0x11   :  { %vm33_vm0 = vcmp.lt.s32.totalorder %v31_v1, 512 }
  0x15   :  { %v26_v2 = vstv %s25_s14  ;;  %v29_v3 = vstv %s41_s15 }
  0x16   :  { %v27_v4 = vmul.f32 %v26_v2, %v24_v0 }
  0x18   :  { %v30_v5 = vadd.f32 %v29_v3, %v27_v4 }
  0x1a   :  { %35 = vst.msk [vmem:[%s84_s2] sm:$0xf] %vm33_vm0, %v30_v5 }
  0x1b   :  { %40 = vsyncpa [#allocation3], 1 }

// kernel: grad_layer.2
= control target key start
LH: loop header
LB: loop body
LE: loop exit
PB: predicated region body
PF: predicated region fallthrough
CT: control target
= control target key end

     0   :  { %s1330_s0 = inlined_call_operand.hbm [shape: f32[2,3,16,16], index: 0, kind: input, shape index: {}, may-alias: {0,1,2}]   ;;  %s1331_s1 = inlined_call_operand.hbm [shape: f32[2,3,16,16], index: 1, kind: input, shape index: {}, may-alias: {0,1,2}]   ;;  %s1332_s2 = inlined_call_operand.hbm [shape: f32[2,3,16,16], index: 2, kind: input, shape index: {}, may-alias: {0,1,2}]   ;;  %s1333_s3 = inlined_call_operand.vmem [shape: f32[2,16,16], index: 3, kind: output, shape index: {0}]   ;;  %s1334_s4 = inlined_call_operand.vmem [shape: f32[2,1,8,256], index: 4, kind: output, shape index: {1}]  }
   0x1   :  { %1343 = sst [smem:[#allocation9_spill]] %s1331_s1 }
   0x2   :  { %10 = vsyncpa [#allocation3], 0 }
   0x3   :  { %12 = vsyncpa [#allocation3 + $0x1], 0 }
   0x4   :  { %13 = vsyncpa [#allocation5], 0 }
   0x5   :  { %15 = vsyncpa [#allocation5 + $0x1], 0  ;;  %s1058_s15 = smov 0   ;;  %s1060_s16 = smov 0  }
   0x6   :  { %s1062_s17 = smov 0   ;;  %s1064_s18 = smov 0  }
   0x7   :  { %s1066_s19 = smov 0   ;;  %s1068_s20 = smov 0  }
   0x8 LB: > { %s1336_s21 = sadd.s32 4294967295, %s1022_s20   ;;  %s33_s22 = sadd.s32 1, %s1018_s19  ;;  %s1022_s20 = sphi %s1068_s20, %s21_s20   ;;  %s1018_s19 = sphi %s1066_s19, %s1362_s19   ;;  %s1014_s18 = sphi %s1064_s18, %s1361_s18   ;;  %s1010_s17 = sphi %s1062_s17, %s1360_s17   ;;  %s1006_s16 = sphi %s1060_s16, %s1359_s16   ;;  %s1002_s15 = sphi %s1058_s15, %s1358_s15  }
   0x9   : > { %p35_p0 = scmp.ge.s32.totalorder %s33_s22, 2  ;;  %s42_s23 = sadd.s32 1, %s1010_s17 }
   0xa   : > { %p49_p1 = scmp.ne.s32.totalorder %s1010_s17, %s1006_s16  ;;  %p50_p2 = scmp.eq.s32.totalorder %s1022_s20, 0 }
   0xb   : > { %s1364_s22 = smov (%p35_p0, %s33_s22), 0  ;;  %p55_p4 = scmp.ne.s32.totalorder %s1006_s16, %s1002_s15 }
   0xc   : > { %p51_p3 = por %p50_p2, %p49_p1  ;;  %s37_s24 = ssub.s32 %s1018_s19, %s1364_s22 }
   0xd   : > { %p56_p5 = scmp.eq.s32.totalorder %s1336_s21, 0  ;;  %p40_p6 = scmp.eq.s32.totalorder %s37_s24, 0 }
   0xe   : > { %p818_p8 = scmp.lt.s32.totalorder %s1022_s20, 2  ;;  %s1108_s27 = sand.u32 1, %s1010_s17  }
   0xf   : > { %p1099_p7 = por %p56_p5, %p55_p4  ;;  %s1111_s28 = smul.u32 768, %s1018_s19 }
  0x10   : > { %s1105_s26 = scalar_select %p40_p6, %s1010_s17, %s42_s23  }
  0x11   : > { %s1344_s25 = scalar_select %p1099_p7, 1, 0 }
  0x12   : > { %p1113_p9 = pnand %p818_p8, %p51_p3  ;;  %s230_s30 = sand.u32 1, %s1022_s20  }
  0x13   : > { %s1337_s5 = smul.u32 24, %s1108_s27  ;;  %s1346_s1 = sld [smem:[#allocation9_spill]] }
  0x14   : > { %s1131_s11 = scalar_lea.sflag [#allocation5], %s230_s30  ;;  %p1137_p13 = pneg %p1113_p9 }
  0x15   : > { %s234_s9 = scalar_lea.vmem [#allocation4], %s1337_s5 }
  0x16   : > { %s246_s10 = sshll.u32 %s234_s9, 4  ;;  %s1129_s10 = int_to_ptr.vmem [resolvable:$true] %s246_s10 }
  0x19   : > { %s1123_s8 = scalar_lea.hbm %s1346_s1, %s1111_s28  ;;  %s883_s23 = scalar_lea.hbm %s1346_s1, 1536 }
  0x1a   : > { %s878_s12 = scalar_lea.hbm %s1123_s8, 384  ;;  %p884_p2 = scmp.lt.u32.totalorder %s1123_s8, %s1346_s1 }
  0x1b   : > { %p879_p12 = scmp.ne.s32.totalorder %s1123_s8, %s878_s12  ;;  %p885_p3 = scmp.lt.u32.totalorder %s883_s23, %s878_s12 }
  0x1c   : > { %p887_p5 = scmp.lt.u32.totalorder %s878_s12, %s1123_s8 }
  0x1d   : > { %p881_p0 = pnand %p1137_p13, %p879_p12  ;;  %p886_p4 = por %p885_p3, %p884_p2 }
  0x1f   : > { %p882_p1 = pneg %p881_p0  ;;  %p888_p6 = por %p887_p5, %p886_p4 }
  0x21   : > { %p889_p8 = pnand %p888_p6, %p882_p1 }
  0x23   : > { %892 = shalt.err (!%p889_p8)
}
  0x24   : > { %s893_s30 = scalar_lea.vmem %s1129_s10, 384  ;;  %s1024_s7 = smov [#allocation4]  }
  0x25   : > { %p894_p12 = scmp.ne.s32.totalorder %s1129_s10, %s893_s30  ;;  %s898_s9 = sshll.u32 %s1024_s7, 4  ;;  %s899_s9 = int_to_ptr.vmem [resolvable:$false] %s898_s9 }
  0x26   : > { %s900_s14 = scalar_lea.vmem %s899_s9, 768  ;;  %p901_p11 = scmp.lt.s32.totalorder %s1129_s10, %s899_s9 }
  0x27   : > { %p896_p0 = pnand %p894_p12, %p1137_p13  ;;  %p902_p7 = scmp.lt.s32.totalorder %s900_s14, %s893_s30 }
  0x29   : > { %p897_p10 = pneg %p896_p0  ;;  %p903_p2 = por %p902_p7, %p901_p11 }
  0x2b   : > { %p904_p3 = pnand %p903_p2, %p897_p10 }
  0x2d   : > { %907 = shalt.err (!%p904_p3)
}
  0x2e   : > { %s1338_s12 = smov 256   ;;  %s1339_s15 = smov 128  }
  0x2f   : > { %s1341_s23 = smov 8   ;;  %p1348_p7 = scmp.lt.s32.totalorder %s1022_s20, 3 }
  0x30   : > { %814 = dma.hbm_to_vmem [thread:$0]  (!%p1113_p9), %s1123_s8, 384, %s1129_s10, %s1131_s11, %s1338_s12, %s1339_s15, %s1341_s23  }
  0x31   : > { %p1349_p10 = scmp.ge.s32.totalorder %s1022_s20, 1  ;;  %s790_s6 = smul.u32 48, %s1108_s27 }
  0x32   : > { %s1177_s9 = scalar_lea.hbm %s1330_s0, %s1111_s28  ;;  %s787_s14 = sadd.s32 128, %s1111_s28 }
  0x33   : > { %p1168_p11 = pnand %p1349_p10, %p1348_p7  ;;  %s211_s21 = scalar_lea.vmem [#allocation2], %s790_s6 }
  0x34   : > { %s220_s5 = sshll.u32 %s211_s21, 4  ;;  %s1183_s12 = scalar_lea.hbm %s1332_s2, %s787_s14  ;;  %s1185_s5 = int_to_ptr.vmem [resolvable:$true] %s220_s5 }
  0x35   : > { %s1350_s24 = scalar_select %p1168_p11, 1, 0 }
  0x36   : > { %s1351_s15 = smul.u32 24, %s1108_s27  ;;  %s208_s7 = scalar_lea.sflag [#allocation3], %s1108_s27 }
  0x37   : > { %s908_s1 = scalar_lea.hbm %s1177_s9, 768  ;;  %s913_s6 = scalar_lea.hbm %s1330_s0, 1536 }
  0x38   : > { %s1189_s23 = scalar_lea.vmem [#allocation6], %s1351_s15  ;;  %p909_p1 = scmp.ne.s32.totalorder %s1177_s9, %s908_s1 }
  0x39   : > { %s272_s30 = sshll.u32 %s1189_s23, 4  ;;  %p914_p6 = scmp.lt.u32.totalorder %s1177_s9, %s1330_s0  ;;  %s1221_s30 = int_to_ptr.vmem [resolvable:$true] %s272_s30 }
  0x3a   : > { %p911_p4 = pnand %p909_p1, %p1137_p13  ;;  %p915_p8 = scmp.lt.u32.totalorder %s913_s6, %s908_s1 }
  0x3b   : > { %p917_p0 = scmp.lt.u32.totalorder %s908_s1, %s1177_s9 }
  0x3c   : > { %p912_p5 = pneg %p911_p4  ;;  %p916_p12 = por %p915_p8, %p914_p6 }
  0x3e   : > { %p918_p2 = por %p917_p0, %p916_p12 }
  0x40   : > { %p919_p3 = pnand %p918_p2, %p912_p5 }
  0x42   : > { %922 = shalt.err (!%p919_p3)
}
  0x43   : > { %s923_s15 = scalar_lea.vmem %s1185_s5, 768  ;;  %s1028_s10 = smov [#allocation2]  }
  0x44   : > { %p924_p7 = scmp.ne.s32.totalorder %s1185_s5, %s923_s15  ;;  %s928_s28 = sshll.u32 %s1028_s10, 4  ;;  %s929_s28 = int_to_ptr.vmem [resolvable:$false] %s928_s28 }
  0x45   : > { %s930_s21 = scalar_lea.vmem %s929_s28, 1536  ;;  %p931_p4 = scmp.lt.s32.totalorder %s1185_s5, %s929_s28 }
  0x46   : > { %p926_p10 = pnand %p924_p7, %p1137_p13  ;;  %p932_p11 = scmp.lt.s32.totalorder %s930_s21, %s923_s15 }
  0x48   : > { %p927_p1 = pneg %p926_p10  ;;  %p933_p6 = por %p932_p11, %p931_p4 }
  0x4a   : > { %p934_p8 = pnand %p933_p6, %p927_p1 }
  0x4c   : > { %937 = shalt.err (!%p934_p8)
}
  0x4d   : > { %s1352_s1 = smov 8   ;;  %s1353_s6 = smov 128  }
  0x4e   : > { %811 = dma.hbm_to_vmem [thread:$0]  (!%p1113_p9), %s1177_s9, 768, %s1185_s5, %s208_s7, %s1353_s6, %s1353_s6, %s1352_s1  }
  0x4f   : > { %s938_s8 = scalar_lea.hbm %s1183_s12, 384  ;;  %s943_s27 = scalar_lea.hbm %s1332_s2, 1536 }
  0x50   : > { %p939_p11 = scmp.ne.s32.totalorder %s1183_s12, %s938_s8  ;;  %p944_p0 = scmp.lt.u32.totalorder %s1183_s12, %s1332_s2 }
  0x51   : > { %p945_p2 = scmp.lt.u32.totalorder %s943_s27, %s938_s8  ;;  %p947_p7 = scmp.lt.u32.totalorder %s938_s8, %s1183_s12 }
  0x52   : > { %p941_p5 = pnand %p939_p11, %p1137_p13 }
  0x53   : > { %p946_p3 = por %p945_p2, %p944_p0 }
  0x54   : > { %p942_p12 = pneg %p941_p5 }
  0x55   : > { %p948_p10 = por %p947_p7, %p946_p3 }
  0x57   : > { %p949_p1 = pnand %p948_p10, %p942_p12 }
  0x59   : > { %952 = shalt.err (!%p949_p1)
}
  0x5a   : > { %s953_s5 = scalar_lea.vmem %s1221_s30, 384  ;;  %s1029_s23 = smov [#allocation6]  }
  0x5b   : > { %p954_p4 = scmp.ne.s32.totalorder %s1221_s30, %s953_s5  ;;  %s958_s9 = sshll.u32 %s1029_s23, 4  ;;  %s959_s9 = int_to_ptr.vmem [resolvable:$false] %s958_s9 }
  0x5c   : > { %s960_s7 = scalar_lea.vmem %s959_s9, 768  ;;  %p961_p11 = scmp.lt.s32.totalorder %s1221_s30, %s959_s9 }
  0x5d   : > { %p956_p6 = pnand %p954_p4, %p1137_p13  ;;  %p962_p5 = scmp.lt.s32.totalorder %s960_s7, %s953_s5 }
  0x5f   : > { %p957_p8 = pneg %p956_p6  ;;  %p963_p0 = por %p962_p5, %p961_p11 }
  0x61   : > { %p964_p2 = pnand %p963_p0, %p957_p8 }
  0x63   : > { %967 = shalt.err (!%p964_p2)
}
  0x64   : > { %s1354_s21 = smov 256   ;;  %p1355_p13 = scmp.ne.s32.totalorder %s1350_s24, 0 }
  0x65   : > { %817 = dma.hbm_to_vmem [thread:$0]  (!%p1113_p9), %s1183_s12, 384, %s1221_s30, %s1131_s11, %s1354_s21, %s1353_s6, %s1352_s1  }
  0x66   : > { %284 = sbr.rel (%p1355_p13) target bundleno = 712 (0x2c8), region = 32  ;;  %s1251_s13 = sand.u32 (!%p1355_p13), 1, %s1006_s16  }
  0x67   : > { %s796_s8 = smul.u32 (!%p1355_p13), 48, %s1251_s13  ;;  %s287_s14 = scalar_lea.sflag (!%p1355_p13), [#allocation3], %s1251_s13 }
  0x68   : > { %p1356_p12 = scmp.ne.s32.totalorder (!%p1355_p13), %s1344_s25, 0 }
  0x69   : > { %s290_s15 = scalar_lea.vmem (!%p1355_p13), [#allocation2], %s796_s8 }
  0x6d   : > { %993 = dma.done.wait (%p1356_p12), %s287_s14, 768  }
  0x6e   : > { %995 = vsyncadd (%p1356_p12), %s287_s14, 4294966528  ;;  %s1357_s29 = sadd.s32 4294967295, %s1022_s20   ;;  %s797_s12 = smul.u32 24, %s1251_s13 }
  0x6f   : > { %s295_s11 = sand.u32 1, %s1357_s29  }
  0x70   : > { %s296_s24 = scalar_lea.sflag [#allocation5], %s295_s11  ;;  %s1264_s30 = scalar_lea.vmem [#allocation4], %s797_s12 }
  0x71   : > { %997 = dma.done.wait (%p1356_p12), %s296_s24, 768  }
  0x72   : > { %999 = vsyncadd (%p1356_p12), %s296_s24, 4294966528  ;;  %v384_v0 = vld [vmem:[%s290_s15] sm:$0xff]  ;;  %v386_v1 = vld [vmem:[%s290_s15 + $0x10] sm:$0xff]  ;;  %s1030_s1 = smov 16   ;;  %vm473_vm0 = vcmask 1047680   ;;  %s1031_s25 = smov 127   ;;  %v422_v31 = vlaneseq }
  0x73   : > { %v388_v2 = vld [vmem:[%s290_s15 + $0x20] sm:$0xff]  ;;  %v390_v3 = vmul.f32 0.25678906, %v384_v0  ;;  %v392_v4 = vmul.f32 0.50412893, %v386_v1  ;;  %v385_v6 = vld [vmem:[%s290_s15 + $0x8] sm:$0xff] }
  0x74   : > { %v396_v5 = vmul.f32 0.09790625, %v388_v2  ;;  %v387_v7 = vld [vmem:[%s290_s15 + $0x18] sm:$0xff]  ;;  %v389_v8 = vld [vmem:[%s290_s15 + $0x28] sm:$0xff]  ;;  %v391_v10 = vmul.f32 0.25678906, %v385_v6 }
  0x75   : > { %v394_v9 = vadd.f32 %v392_v4, %v390_v3  ;;  %v393_v11 = vmul.f32 0.50412893, %v387_v7  ;;  %v397_v12 = vmul.f32 0.09790625, %v389_v8  ;;  %s1032_s6 = smov 113   ;;  %s308_s27 = scalar_lea.vmem [#allocation6], %s797_s12 }
  0x76   : > { %v401_v24 = vld [vmem:[%s1264_s30 + $0x7] sm:$0x1]  ;;  %v402_v25 = vld [vmem:[%s1264_s30 + $0xf] sm:$0x1]  ;;  %v403_v28 = vld [vmem:[%s1264_s30 + $0x17] sm:$0x1] }
  0x77   : > { %v1270_v13 = vadd.f32 %v396_v5, %v394_v9  ;;  %v395_v14 = vadd.f32 %v393_v11, %v391_v10  ;;  %v404_v26 = vmul.f32 0.25678906, %v401_v24  ;;  %v405_v27 = vmul.f32 0.50412893, %v402_v25  ;;  %v409_v29 = vld [vmem:[%s308_s27] sm:$0x1] }
  0x78   : > { %v410_v30 = vld [vmem:[%s308_s27 + $0x8] sm:$0x1]  ;;  %v407_v33 = vmul.f32 0.09790625, %v403_v28  ;;  %v412_v34 = vmul.f32 0.25678906, %v409_v29 }
  0x79   : > { %474 = vrot.lane.b32.xlu0 %v1270_v13, %s1030_s1  ;;  %v1273_v15 = vadd.f32 %v397_v12, %v395_v14  ;;  %v406_v32 = vadd.f32 %v405_v27, %v404_v26  ;;  %v413_v35 = vmul.f32 0.50412893, %v410_v30  ;;  %v411_v36 = vld [vmem:[%s308_s27 + $0x10] sm:$0x1]  ;;  %v423_v37 = vshrl.u32 %v422_v31, 7  ;;  %p366_p9 = scmp.lt.s32.totalorder %s1014_s18, 1 }
  0x7a   : > { %v415_v40 = vmul.f32 0.09790625, %v411_v36  ;;  %v432_v44 = vrot.slane %v1270_v13, 7  ;;  %v449_v49 = vrot.slane %v1270_v13, 1  ;;  %v426_v53 = vand.u32 127, %v422_v31 }
  0x7b   : > { %v408_v38 = vadd.f32 %v407_v33, %v406_v32  ;;  %v414_v39 = vadd.f32 %v413_v35, %v412_v34  ;;  %v443_v42 = vsub.s32 0, %v423_v37  ;;  %v433_v43 = vrot.slane %v1273_v15, 7  ;;  %s1366_s18 = smov (!%p366_p9, %s1014_s18), 1 }
  0x7c   : > { %vm434_vm1 = vcmp.lt.s32.totalorder %v423_v37, 1  ;;  %v424_v46 = vadd.s32 8, %v423_v37  ;;  %v450_v48 = vrot.slane %v1273_v15, 1  ;;  %vm430_vm2 = vcmp.eq.s32.totalorder %v423_v37, 0  ;;  %s788_s10 = sshll.u32 %s1366_s18, 4 }
  0x7d   : > { %477 = vrot.lane.b32.xlu0 %v1273_v15, %s1030_s1  ;;  %v421_v41 = vmul.f32 0.0, %v408_v38  ;;  %v416_v45 = vadd.f32 %v415_v40, %v414_v39  ;;  %vm451_vm3 = vcmp.lt.s32.totalorder %v423_v37, 7  ;;  %v436_v50 = vsel %vm434_vm1, %v433_v43, %v432_v44  ;;  %s373_s23 = scalar_lea.vmem %s1333_s3, %s788_s10  ;;  %s383_s21 = scalar_lea.vmem %s1334_s4, %s788_s10 }
  0x7e   : > { %vm448_vm4 = vcmp.eq.s32.totalorder %v424_v46, 15  ;;  %v453_v52 = vsel %vm451_vm3, %v450_v48, %v449_v49  ;;  %v452_v55 = vsel %vm451_vm3, %v449_v49, %v450_v48  ;;  %vm465_vm5 = vcmp.ge.s32.totalorder %v424_v46, 15 }
  0x7f   : > { %v444_v47 = vrot.slane %v421_v41, %v443_v42  ;;  %v461_v51 = vrot.slane %v416_v45, %v443_v42  ;;  %vm472_vm6 = vcmp.eq.s32.totalorder %v426_v53, 15  ;;  %vm498_vm7 = vcmp.eq.s32.totalorder %v426_v53, 0 }
  0x80   : > { %v435_v59 = vsel %vm434_vm1, %v432_v44, %v433_v43  ;;  %vm535_vm9 = vcmask 130048  }
  0x81   : > { %v445_v54 = vsel %vm430_vm2, %v444_v47, %v436_v50  ;;  %v463_v57 = vsel %vm448_vm4, %v461_v51, %v453_v52 }
  0x82   : > { %v509_v58 = vsub.f32 %v452_v55, %v445_v54  ;;  %v471_v60 = vsel %vm465_vm5, 0.0, %v463_v57 }
  0x83   : > { %v510_v3 = vsub.f32 %v471_v60, %v435_v59 }
  0x84   : > { %v513_v2 = vmul.f32 %v509_v58, %v509_v58 }
  0x85   : > { %v514_v10 = vmul.f32 %v510_v3, %v510_v3 }
  0xeb   : > { %v475_v16 = vpop.permute.xlu0 %474 }
  0xec   : > { %v476_v17 = vsel %vm473_vm0, %v475_v16, %v1270_v13 }
  0xed   : > { %480 = vrot.lane.b32.xlu1 %v476_v17, %s1030_s1 }
  0xef   : > { %v478_v18 = vpop.permute.xlu0 %477 }
  0xf0   : > { %v479_v19 = vsel %vm473_vm0, %v478_v18, %v1273_v15 }
  0xf1   : > { %482 = vrot.lane.b32.xlu1 %v479_v19, %s1030_s1 }
 0x15f   : > { %v481_v20 = vpop.permute.xlu1 %480 }
 0x160   : > { %v484_v21 = vsel %vm473_vm0, %v481_v20, %v1270_v13 }
 0x161   : > { %490 = vrot.lane.b32.xlu0 %v484_v21, %s1031_s25 }
 0x163   : > { %v483_v22 = vpop.permute.xlu1 %482 }
 0x164   : > { %v485_v23 = vsel %vm473_vm0, %v483_v22, %v1273_v15 }
 0x165   : > { %501 = vrot.lane.b32.xlu0 %v484_v21, %s1032_s6  ;;  %492 = vrot.lane.b32.xlu1 %v485_v23, %s1031_s25 }
 0x169   : > { %503 = vrot.lane.b32.xlu1 %v485_v23, %s1032_s6 }
 0x1d3   : > { %v491_v56 = vpop.permute.xlu0 %490 }
 0x1d4   : > { %v496_v63 = vsel %vm472_vm6, 0.0, %v491_v56 }
 0x1d7   : > { %v493_v61 = vpop.permute.xlu1 %492  ;;  %v502_v62 = vpop.permute.xlu0 %501 }
 0x1d8   : > { %v507_v0 = vsel %vm498_vm7, 0.0, %v502_v62  ;;  %v497_v6 = vsel %vm472_vm6, 0.0, %v493_v61 }
 0x1d9   : > { %v511_v1 = vsub.f32 %v496_v63, %v507_v0 }
 0x1db   : > { %v515_v4 = vmul.f32 %v511_v1, %v511_v1  ;;  %v504_v5 = vpop.permute.xlu1 %503 }
 0x1dc   : > { %v508_v7 = vsel %vm498_vm7, 0.0, %v504_v5 }
 0x1dd   : > { %v517_v8 = vadd.f32 %v515_v4, %v513_v2  ;;  %v512_v9 = vsub.f32 %v497_v6, %v508_v7 }
 0x1df   : > { %v519_v11 = vadd.f32 1e-06, %v517_v8  ;;  %v516_v12 = vmul.f32 %v512_v9, %v512_v9 }
 0x1e1   : > { %v518_v13 = vadd.f32 %v516_v12, %v514_v10  ;;  %874 = vrsqrt.f32 %v519_v11  ;;  %vm523_vm8 = vcmp.eq.f32.partialorder %v519_v11, inf  ;;  %v526_v17 = vand.u32 2147483648, %v519_v11 }
 0x1e2   : > { %vm525_vm10 = vcmp.eq.f32.partialorder %v519_v11, 0.0 }
 0x1e3   : > { %v520_v14 = vadd.f32 1e-06, %v518_v13 }
 0x1e5   : > { %876 = vrsqrt.f32 %v520_v14  ;;  %vm530_vm11 = vcmp.eq.f32.partialorder %v520_v14, inf  ;;  %v533_v22 = vand.u32 2147483648, %v520_v14  ;;  %vm532_vm12 = vcmp.eq.f32.partialorder %v520_v14, 0.0 }
 0x1eb   : > { %v875_v15 = vpop.eup %874 }
 0x1ec   : > { %v522_v16 = vmul.f32 %v875_v15, %v519_v11 }
 0x1ee   : > { %v524_v18 = vsel %vm523_vm8, %v519_v11, %v522_v16 }
 0x1ef   : > { %v877_v19 = vpop.eup %876  ;;  %v527_v20 = vsel %vm525_vm10, %v526_v17, %v524_v18 }
 0x1f0   : > { %v529_v21 = vmul.f32 %v877_v19, %v520_v14  ;;  %536 = vst.msk [vmem:[%s373_s23] sm:$0xff] %vm535_vm9, %v527_v20  ;;  %v560_v25 = vsel %vm535_vm9, %v527_v20, -inf  ;;  %v546_v27 = vsel %vm535_vm9, %v527_v20, inf }
 0x1f2   : > { %v531_v23 = vsel %vm530_vm11, %v520_v14, %v529_v21 }
 0x1f3   : > { %v534_v24 = vsel %vm532_vm12, %v533_v22, %v531_v23 }
 0x1f4   : > { %v561_v26 = vsel %vm535_vm9, %v534_v24, -inf  ;;  %v547_v28 = vsel %vm535_vm9, %v534_v24, inf  ;;  %537 = vst.msk [vmem:[%s373_s23 + $0x8] sm:$0xff] %vm535_vm9, %v534_v24 }
 0x1f5   : > { %v562_v29 = vmax.f32 %v560_v25, %v561_v26  ;;  %v548_v30 = vmin.f32 %v546_v27, %v547_v28 }
 0x1f7   : > { %563 = vmax.xlane.f32.xlu1 %v562_v29  ;;  %549 = vmin.xlane.f32.xlu0 %v548_v30 }
 0x284   : > { %v564_v31 = vpop.xlane.xlu1 %563  ;;  %v550_v32 = vpop.xlane.xlu0 %549 }
 0x285   : > { %v565_v33 = vrot.slane %v564_v31, 4  ;;  %v551_v34 = vrot.slane %v550_v32, 4 }
 0x287   : > { %v566_v35 = vmax.f32 %v564_v31, %v565_v33  ;;  %v552_v36 = vmin.f32 %v550_v32, %v551_v34 }
 0x289   : > { %v567_v37 = vrot.slane %v566_v35, 2  ;;  %v553_v38 = vrot.slane %v552_v36, 2 }
 0x28b   : > { %v568_v39 = vmax.f32 %v566_v35, %v567_v37  ;;  %v554_v40 = vmin.f32 %v552_v36, %v553_v38 }
 0x28d   : > { %v555_v41 = vrot.slane %v554_v40, 1  ;;  %v569_v42 = vrot.slane %v568_v39, 1 }
 0x28f   : > { %v556_v43 = vmin.f32 %v554_v40, %v555_v41  ;;  %v570_v44 = vmax.f32 %v568_v39, %v569_v42 }
 0x291   : > { %798 = vpush %v556_v43 }
 0x292   : > { %800 = vpush %v570_v44 }
 0x2c2   : > { %s799_s13 = spop %798 }
 0x2c3   : > { %v572_v45 = vstv %s799_s13  ;;  %s801_s8 = spop %800 }
 0x2c4   : > { %575 = vst [vmem:[%s383_s21] sm:$0xff] %v572_v45  ;;  %s573_s14 = ssub.f32 0.0, %s801_s8 }
 0x2c6   : > { %v574_v46 = vstv %s573_s14 }
 0x2c7   : > { %576 = vst [vmem:[%s383_s21 + $0x8] sm:$0xff] %v574_v46 }
 0x2c8 PF: > { %s21_s20 = sadd.s32 1, %s1022_s20   ;;  %s1358_s15 = smov %s1006_s16 }
 0x2c9   : > { %p18_p3 = scmp.ge.s32.totalorder %s21_s20, 4   ;;  %s1359_s16 = smov %s1010_s17 }
 0x2ca   : > { %s1360_s17 = smov %s1105_s26  ;;  %s1361_s18 = smov %s1018_s19 }
 0x2cb   : > { %s1362_s19 = smov %s1364_s22  ;;  %20 = sbr.rel (!%p18_p3) target bundleno = 8 (0x8), region = 108 }
 0x2d2   :  { %631 = vsyncpa [#allocation3], 1 }
 0x2d3   :  { %633 = vsyncpa [#allocation3 + $0x1], 1 }
 0x2d4   :  { %634 = vsyncpa [#allocation5], 1 }
 0x2d5   :  { %636 = vsyncpa [#allocation5 + $0x1], 1 }

</bundles_post_ra>
